<compile_context>
chip_gen: v5e
topology: v5e:2x2
jax: 0.10.0
libtpu: 0.0.40
codegen_flags: <defaults>
</compile_context>

<pallas_src>
import math

import jax
import jax.numpy as jnp
from jax.experimental import pallas as pl
from jax.experimental.pallas import tpu as pltpu


def _make_pad_kernel(H, W, top, bottom, left, right, Wo, fill_value):
    """Kernel over a (B, H, W) block: compose the (B, Ho, Wo) padded tile in
    vregs via concatenation and issue a single aligned full-block store
    (no fill-then-overwrite double write)."""

    def pad_kernel(x_ref, o_ref):
        x = x_ref[...]                      # (B, H, W)
        b = x.shape[0]
        dt = o_ref.dtype

        def const(shape):
            # jnp.full casts fill_value to the tensor dtype (handles int/bool).
            return jnp.full(shape, fill_value, dtype=dt)

        # Pad along W (lane dim): [left consts | x | right consts].
        row_parts = []
        if left:
            row_parts.append(const((b, H, left)))
        row_parts.append(x.astype(dt))
        if right:
            row_parts.append(const((b, H, right)))
        mid = row_parts[0] if len(row_parts) == 1 else jnp.concatenate(row_parts, axis=2)

        # Pad along H (sublane dim): [top rows ; mid ; bottom rows].
        parts = []
        if top:
            parts.append(const((b, top, Wo)))
        parts.append(mid)
        if bottom:
            parts.append(const((b, bottom, Wo)))
        tile = parts[0] if len(parts) == 1 else jnp.concatenate(parts, axis=1)

        # Single full-block store (aligned, no masked interior overwrite).
        o_ref[...] = tile

    return pad_kernel


def pallas_constant_pad_last2(x, pads4, value):
    """Constant-pad the last two dims of `x`.

    pads4: (w_left, w_right, h_top, h_bottom), all >= 0 (F.pad ordering).
    """
    w_l, w_r, h_t, h_b = (int(p) for p in pads4)
    if x.ndim < 2:
        raise NotImplementedError("Input must have rank >= 2.")

    *lead, H, W = x.shape
    NC = math.prod(lead) if lead else 1
    Ho = H + h_t + h_b
    Wo = W + w_l + w_r

    # Collapse all leading dims into one batch axis -> big, step-overhead-free blocks.
    x3 = x.reshape(NC, H, W)

    itemsize = jnp.dtype(x.dtype).itemsize
    bytes_per_slice = (H * W + Ho * Wo) * itemsize
    # Target a few MiB per grid step (in + out). With double-buffering this
    # stays well under the 32 MiB default scoped VMEM limit on all of
    # v5e/v6e/v7x, so no vmem_limit_bytes override is needed.
    target_bytes = 4 * 1024 * 1024
    block_rows = max(1, target_bytes // max(1, bytes_per_slice))
    block_rows = min(block_rows, NC)
    if NC >= 2:
        # Keep at least 2 grid steps so v7x's two TensorCores both get work.
        block_rows = min(block_rows, pl.cdiv(NC, 2))
    grid = (pl.cdiv(NC, block_rows),)

    kernel = _make_pad_kernel(H, W, h_t, h_b, w_l, w_r, Wo, value)

    # TODO(synk): for very small Wo (<<128) a lane-dense flattened (B, Ho*Wo)
    # output layout would avoid masked stores; kept (B, Ho, Wo) here since the
    # in-kernel (Ho, Wo)->(Ho*Wo) relayout is not reliably cheap.
    out3 = pl.pallas_call(
        kernel,
        out_shape=jax.ShapeDtypeStruct((NC, Ho, Wo), x.dtype),
        grid=grid,
        in_specs=[pl.BlockSpec((block_rows, H, W), lambda i: (i, 0, 0))],
        out_specs=pl.BlockSpec((block_rows, Ho, Wo), lambda i: (i, 0, 0)),
        compiler_params=pltpu.CompilerParams(
            dimension_semantics=("parallel",)),
        cost_estimate=pl.CostEstimate(
            flops=0,
            transcendentals=0,
            bytes_accessed=NC * (H * W + Ho * Wo) * itemsize),
    )(x3)

    return out3.reshape(*lead, Ho, Wo)


def _normalize_pads(pads, ndim):
    """Accept F.pad-style pads of even length up to 2*ndim (e.g. 4 for HW-only
    or 8 for NCHW with zeros on N/C). Returns (w_l, w_r, h_t, h_b)."""
    pads = [int(p) for p in pads]
    if len(pads) == 0 or len(pads) % 2 != 0 or len(pads) > 2 * ndim:
        raise NotImplementedError(
            "pads must have even length <= 2 * input rank.")
    if any(p < 0 for p in pads):
        # TODO(synk): negative pads (cropping) not implemented in the Pallas kernel.
        raise NotImplementedError("Negative pads (crop) are not supported.")
    w_l, w_r = pads[0], pads[1]
    h_t, h_b = (pads[2], pads[3]) if len(pads) >= 4 else (0, 0)
    if any(p != 0 for p in pads[4:]):
        # TODO(synk): padding of dims other than the last two not implemented.
        raise NotImplementedError(
            "Only padding of the last two dims is supported (leading-dim pads must be 0).")
    return w_l, w_r, h_t, h_b


class Pad:
    """JAX/Pallas equivalent of onnx2pytorch.operations.pad.Pad."""

    def __init__(self, mode="constant", padding=None):
        self.mode = mode
        self.padding = padding

    def __call__(self, input, pads=None, value=0):
        return self.forward(input, pads=pads, value=value)

    def forward(self, input, pads=None, value=0):
        if self.padding is not None:
            pads = self.padding
        elif pads is None:
            raise TypeError(
                "pad forward() missing 1 required positional argument: 'pads'")
        if self.mode != "constant":
            # TODO(synk): reflect/replicate pad modes not implemented in the Pallas kernel.
            raise NotImplementedError("Only 'constant' mode is implemented.")
        pads4 = _normalize_pads(list(pads), input.ndim)
        # Pass `value` through unchanged; the kernel casts it with the tensor's
        # dtype (avoids silent float() truncation for int/bool tensors).
        return pallas_constant_pad_last2(input, pads4, value)


if __name__ == "__main__":
    key = jax.random.PRNGKey(0)
    x = jax.random.normal(key, (2, 4, 16, 16), dtype=jnp.float32)

    # F.pad-style pads for last two dims: (w_left, w_right, h_top, h_bottom)
    pads = (1, 2, 3, 4)
    value = 1.5

    pad_op = Pad(mode="constant", padding=pads)
    out = pad_op(x, value=value)
    out = jax.block_until_ready(out)

    # Reference (plain JAX) for correctness check.
    ref = jnp.pad(
        x,
        ((0, 0), (0, 0), (pads[2], pads[3]), (pads[0], pads[1])),
        mode="constant",
        constant_values=value,
    )
    assert out.shape == (2, 4, 16 + 3 + 4, 16 + 1 + 2), out.shape
    assert jnp.allclose(out, ref), "mismatch vs reference pad"

    # Also check the ONNX-style 8-length pads form (zeros on N/C).
    pad_op8 = Pad(mode="constant")
    out8 = jax.block_until_ready(
        pad_op8(x, pads=(1, 2, 3, 4, 0, 0, 0, 0), value=value))
    assert jnp.allclose(out8, ref), "mismatch vs reference pad (8-length pads)"

    print("KERNEL_OK")
</pallas_src>

<mosaic_0001>
module attributes {stable_mosaic.version = 11 : i64} {
  func.func @pad_kernel(%arg0: i32, %arg1: memref<4x16x16xf32, #tpu.memory_space<vmem>>, %arg2: memref<4x23x19xf32, #tpu.memory_space<vmem>>) attributes {dimension_semantics = [#tpu.dimension_semantics<parallel>], iteration_bounds = array<i64: 2>, scalar_prefetch = 0 : i64, scratch_operands = 0 : i64, tpu.core_type = #tpu.core_type<tc>, window_params = [{transform_indices = @transform_0, window_bounds = array<i64: 4, 16, 16>}, {transform_indices = @transform_1, window_bounds = array<i64: 4, 23, 19>}]} {
    %c0 = arith.constant 0 : index
    %c0_0 = arith.constant 0 : index
    %c0_1 = arith.constant 0 : index
    %0 = vector.load %arg1[%c0, %c0_0, %c0_1] : memref<4x16x16xf32, #tpu.memory_space<vmem>>, vector<4x16x16xf32>
    %cst = arith.constant 1.500000e+00 : f32
    %1 = vector.broadcast %cst : f32 to vector<4x16x1xf32>
    %cst_2 = arith.constant 1.500000e+00 : f32
    %2 = vector.broadcast %cst_2 : f32 to vector<4x16x2xf32>
    %3 = tpu.concatenate %1, %0, %2 in 2 : vector<4x16x1xf32>, vector<4x16x16xf32>, vector<4x16x2xf32> -> vector<4x16x19xf32>
    %cst_3 = arith.constant 1.500000e+00 : f32
    %4 = vector.broadcast %cst_3 : f32 to vector<4x3x19xf32>
    %cst_4 = arith.constant 1.500000e+00 : f32
    %5 = vector.broadcast %cst_4 : f32 to vector<4x4x19xf32>
    %6 = tpu.concatenate %4, %3, %5 in 1 : vector<4x3x19xf32>, vector<4x16x19xf32>, vector<4x4x19xf32> -> vector<4x23x19xf32>
    %c0_5 = arith.constant 0 : index
    %c0_6 = arith.constant 0 : index
    %c0_7 = arith.constant 0 : index
    %7 = vector.load %arg2[%c0_5, %c0_6, %c0_7] : memref<4x23x19xf32, #tpu.memory_space<vmem>>, vector<4x23x19xf32>
    tpu.vector_store %arg2[%c0_5, %c0_6, %c0_7], %6 {strides = array<i32>} : memref<4x23x19xf32, #tpu.memory_space<vmem>>, vector<4x23x19xf32>,
    return
  }
  func.func @transform_0(%arg0: i32) -> (i32, i32, i32) {
    %c0_i32 = arith.constant 0 : i32
    %c0_i32_0 = arith.constant 0 : i32
    %c0_i32_1 = arith.constant 0 : i32
    return %arg0, %c0_i32, %c0_i32_0 : i32, i32, i32
  }
  func.func @transform_1(%arg0: i32) -> (i32, i32, i32) {
    %c0_i32 = arith.constant 0 : i32
    %c0_i32_0 = arith.constant 0 : i32
    %c0_i32_1 = arith.constant 0 : i32
    return %arg0, %c0_i32, %c0_i32_0 : i32, i32, i32
  }
}

</mosaic_0001>

<bundles_post_ra>
// kernel: tpu_custom_call.1
= control target key start
LH: loop header
LB: loop body
LE: loop exit
PB: predicated region body
PF: predicated region fallthrough
CT: control target
= control target key end

     0   :  { %6 = vsyncpa [#allocation3], 0  ;;  %s609_s0 = inlined_call_operand.hbm [shape: f32[8,16,16], index: 0, kind: input, shape index: {}]   ;;  %s610_s1 = inlined_call_operand.vmem [shape: f32[8,23,19], index: 1, kind: output, shape index: {}]  }
   0x1   :  { %8 = vsyncpa [#allocation3 + $0x1], 0  ;;  %s464_s6 = smov 0   ;;  %s466_s7 = smov 0  }
   0x2   :  { %s468_s8 = smov 0   ;;  %s470_s9 = smov 0  }
   0x3 LB: > { %s326_s10 = sadd.s32 4294967295, %s449_s9   ;;  %s484_s11 = sadd.s32 1, %s449_s9   ;;  %s449_s9 = sphi %s470_s9, %s617_s9   ;;  %s445_s8 = sphi %s468_s8, %s616_s8   ;;  %s441_s7 = sphi %s466_s7, %s615_s7   ;;  %s437_s6 = sphi %s464_s6, %s614_s6  }
   0x4   : > { %s18_s12 = ssub.s32 %s449_s9, %s484_s11  ;;  %s21_s13 = sadd.s32 1, %s445_s8 }
   0x5   : > { %p19_p0 = scmp.eq.s32.totalorder %s18_s12, 0  ;;  %p28_p1 = scmp.ne.s32.totalorder %s445_s8, %s441_s7 }
   0x6   : > { %p29_p2 = scmp.eq.s32.totalorder %s449_s9, 0  ;;  %p34_p3 = scmp.ne.s32.totalorder %s441_s7, %s437_s6 }
   0x7   : > { %s494_s14 = scalar_select %p19_p0, %s445_s8, %s21_s13  }
   0x8   : > { %p496_p4 = por %p29_p2, %p28_p1  ;;  %p35_p5 = scmp.eq.s32.totalorder %s326_s10, 0 }
   0x9   : > { %p349_p6 = scmp.lt.s32.totalorder %s449_s9, 2  ;;  %s84_s17 = sand.u32 1, %s445_s8  }
   0xa   : > { %p503_p7 = por %p35_p5, %p34_p3  ;;  %s330_s18 = sshll.u32 %s84_s17, 6 }
   0xb   : > { %s341_s19 = sshll.u32 %s449_s9, 6  ;;  %s88_s23 = scalar_lea.vmem [#allocation2], %s330_s18 }
   0xc   : > { %s94_s22 = scalar_lea.hbm %s609_s0, %s341_s19  ;;  %s97_s24 = sshll.u32 %s88_s23, 4  ;;  %s98_s24 = int_to_ptr.vmem [resolvable:$true] %s97_s24 }
   0xd   : > { %s95_s25 = sshll.u32 %s94_s22, 4  ;;  %p514_p8 = pnand %p349_p6, %p496_p4  ;;  %s96_s25 = int_to_ptr.hbm [resolvable:$true] %s95_s25 }
   0xe   : > { %p334_p9 = scmp.ge.s32.totalorder %s449_s9, 1  ;;  %s85_s27 = scalar_lea.sflag [#allocation3], %s84_s17 }
   0xf   : > { %s385_s28 = sshra.s32 %s96_s25, 4  ;;  %p389_p11 = pneg %p514_p8  ;;  %s386_s28 = int_to_ptr.hbm [resolvable:$true] %s385_s28 }
  0x10   : > { %s387_s29 = scalar_lea.hbm %s386_s28, 64  ;;  %s392_s3 = scalar_lea.hbm %s609_s0, 128 }
  0x11   : > { %p388_p10 = scmp.ne.s32.totalorder %s386_s28, %s387_s29  ;;  %p393_p0 = scmp.lt.s32.totalorder %s386_s28, %s609_s0 }
  0x12   : > { %p394_p1 = scmp.lt.s32.totalorder %s392_s3, %s387_s29 }
  0x13   : > { %p390_p12 = pnand %p389_p11, %p388_p10 }
  0x14   : > { %p395_p2 = por %p394_p1, %p393_p0 }
  0x15   : > { %p391_p13 = pneg %p390_p12 }
  0x17   : > { %p396_p3 = pnand %p395_p2, %p391_p13 }
  0x19   : > { %399 = shalt.err (!%p396_p3)
}
  0x1a   : > { %s451_s6 = smov 128   ;;  %s452_s12 = smov 8  }
  0x1b   : > { %348 = dma.hbm_to_vmem [thread:$0]  (!%p514_p8), %s96_s25, 1024, %s98_s24, %s85_s27, %s451_s6, %s451_s6, %s452_s12  }
  0x1c   : > { %p105_p4 = scmp.lt.s32.totalorder %s449_s9, 3 }
  0x1e   : > { %p106_p5 = pnand %p334_p9, %p105_p4 }
  0x1f   : > { %s111_s13 = sand.u32 (!%p106_p5), 1, %s441_s7  }
  0x20   : > { %109 = sbr.rel (%p106_p5) target bundleno = 178 (0xb2), region = 24  ;;  %s335_s15 = sshll.u32 (!%p106_p5), %s111_s13, 6 }
  0x21   : > { %s112_s17 = scalar_lea.sflag (!%p106_p5), [#allocation3], %s111_s13  ;;  %s115_s18 = scalar_lea.vmem (!%p106_p5), [#allocation2], %s335_s15 }
  0x25   : > { %432 = dma.done.wait (%p503_p7), %s112_s17, 1024  }
  0x26   : > { %434 = vsyncadd (%p503_p7), %s112_s17, 4294966272  ;;  %v146_v0 = vld [vmem:[%s115_s18 + $0x10] sm:$0xff]  ;;  %v144_v1 = vld [vmem:[%s115_s18] sm:$0xff]  ;;  %s453_s19 = smov 1   ;;  %s336_s16 = sshll.u32 %s326_s10, 2  ;;  %vm184_vm0 = vcmask 7168  }
  0x27   : > { %164 = vrot.lane.b32.xlu1 %v146_v0, %s453_s19  ;;  %160 = vrot.lane.b32.xlu0 %v144_v1, %s453_s19  ;;  %v148_v2 = vld [vmem:[%s115_s18 + $0x20] sm:$0xff]  ;;  %v147_v3 = vld [vmem:[%s115_s18 + $0x18] sm:$0xff]  ;;  %p138_p6 = scmp.lt.s32.totalorder %s336_s16, 7  ;;  %vm193_vm1 = vcmask 138240   ;;  %vm210_vm2 = vcmask 1042432   ;;  %vm243_vm3 = vcmask 154624  }
  0x28   : > { %168 = vrot.lane.b32.xlu2 %v148_v2, %s453_s19  ;;  %v145_v4 = vld [vmem:[%s115_s18 + $0x8] sm:$0xff]  ;;  %v151_v6 = vld [vmem:[%s115_s18 + $0x38] sm:$0xff]  ;;  %v150_v7 = vld [vmem:[%s115_s18 + $0x30] sm:$0xff]  ;;  %vm246_vm4 = vcmask 153600  }
  0x29   : > { %v149_v5 = vld [vmem:[%s115_s18 + $0x28] sm:$0xff]  ;;  %s619_s16 = smov (!%p138_p6, %s336_s16), 7 }
  0x2a   : > { %s342_s20 = smul.u32 24, %s619_s16 }
  0x2c   : > { %s548_s21 = scalar_lea.vmem %s610_s1, %s342_s20 }
  0x2f   : > { %166 = vrot.lane.b32.xlu1 %v147_v3, %s453_s19  ;;  %162 = vrot.lane.b32.xlu0 %v145_v4, %s453_s19 }
  0x30   : > { %170 = vrot.lane.b32.xlu2 %v149_v5, %s453_s19 }
  0x37   : > { %174 = vrot.lane.b32.xlu1 %v151_v6, %s453_s19  ;;  %172 = vrot.lane.b32.xlu0 %v150_v7, %s453_s19 }
  0x82   : > { %v169_v8 = vpop.permute.xlu2 %168 }
  0x83   : > { %v189_v9 = vsel %vm184_vm0, 1.5, %v169_v8 }
  0x84   : > { %v198_v10 = vsel %vm193_vm1, %v189_v9, 1.5 }
  0x85   : > { %v217_v13 = vrot.slane %v198_v10, 5 }
  0x87   : > { %v237_v21 = vsel %vm210_vm2, 1.5, %v217_v13 }
  0x88   : > { %251 = vst.msk [vmem:[%s548_s21 + $0x30] sm:$0xff] %vm243_vm3, %v237_v21 }
  0x8a   : > { %v171_v20 = vpop.permute.xlu2 %170 }
  0x8b   : > { %v190_v24 = vsel %vm184_vm0, 1.5, %v171_v20 }
  0x8c   : > { %v199_v29 = vsel %vm193_vm1, %v190_v24, 1.5 }
  0x8d   : > { %v218_v34 = vrot.slane %v199_v29, 5 }
  0x8f   : > { %v241_v39 = vsel %vm210_vm2, %v218_v34, 1.5  ;;  %v219_v42 = vsel %vm210_vm2, %v217_v13, %v218_v34 }
  0x90   : > { %252 = vst.msk [vmem:[%s548_s21 + $0x38] sm:$0xff] %vm243_vm3, %v219_v42 }
  0x91   : > { %253 = vst.msk [vmem:[%s548_s21 + $0x40] sm:$0x7f] %vm246_vm4, %v241_v39 }
  0x99   : > { %v165_v11 = vpop.permute.xlu1 %164  ;;  %v161_v12 = vpop.permute.xlu0 %160 }
  0x9a   : > { %v187_v14 = vsel %vm184_vm0, 1.5, %v165_v11  ;;  %v185_v15 = vsel %vm184_vm0, 1.5, %v161_v12 }
  0x9b   : > { %v196_v16 = vsel %vm193_vm1, %v187_v14, 1.5  ;;  %v194_v17 = vsel %vm193_vm1, %v185_v15, 1.5 }
  0x9c   : > { %v214_v18 = vrot.slane %v196_v16, 5  ;;  %v211_v19 = vrot.slane %v194_v17, 5 }
  0x9e   : > { %v236_v22 = vsel %vm210_vm2, 1.5, %v214_v18  ;;  %v235_v23 = vsel %vm210_vm2, 1.5, %v211_v19 }
  0x9f   : > { %244 = vst.msk [vmem:[%s548_s21] sm:$0xff] %vm243_vm3, %v235_v23 }
  0xa0   : > { %248 = vst.msk [vmem:[%s548_s21 + $0x18] sm:$0xff] %vm243_vm3, %v236_v22 }
  0xa1   : > { %v167_v25 = vpop.permute.xlu1 %166  ;;  %v163_v26 = vpop.permute.xlu0 %162 }
  0xa2   : > { %v188_v27 = vsel %vm184_vm0, 1.5, %v167_v25  ;;  %v186_v28 = vsel %vm184_vm0, 1.5, %v163_v26 }
  0xa3   : > { %v197_v30 = vsel %vm193_vm1, %v188_v27, 1.5  ;;  %v195_v31 = vsel %vm193_vm1, %v186_v28, 1.5 }
  0xa4   : > { %v215_v32 = vrot.slane %v197_v30, 5  ;;  %v212_v33 = vrot.slane %v195_v31, 5 }
  0xa6   : > { %v216_v35 = vsel %vm210_vm2, %v214_v18, %v215_v32  ;;  %v213_v36 = vsel %vm210_vm2, %v211_v19, %v212_v33  ;;  %v239_v37 = vsel %vm210_vm2, %v212_v33, 1.5  ;;  %v240_v38 = vsel %vm210_vm2, %v215_v32, 1.5 }
  0xa7   : > { %245 = vst.msk [vmem:[%s548_s21 + $0x8] sm:$0xff] %vm243_vm3, %v213_v36 }
  0xa8   : > { %247 = vst.msk [vmem:[%s548_s21 + $0x10] sm:$0x7f] %vm246_vm4, %v239_v37 }
  0xa9   : > { %249 = vst.msk [vmem:[%s548_s21 + $0x20] sm:$0xff] %vm243_vm3, %v216_v35  ;;  %v175_v40 = vpop.permute.xlu1 %174  ;;  %v173_v41 = vpop.permute.xlu0 %172 }
  0xaa   : > { %250 = vst.msk [vmem:[%s548_s21 + $0x28] sm:$0x7f] %vm246_vm4, %v240_v38  ;;  %v192_v43 = vsel %vm184_vm0, 1.5, %v175_v40  ;;  %v191_v44 = vsel %vm184_vm0, 1.5, %v173_v41 }
  0xab   : > { %v201_v45 = vsel %vm193_vm1, %v192_v43, 1.5  ;;  %v200_v46 = vsel %vm193_vm1, %v191_v44, 1.5 }
  0xac   : > { %v221_v47 = vrot.slane %v201_v45, 5  ;;  %v220_v48 = vrot.slane %v200_v46, 5 }
  0xae   : > { %v242_v49 = vsel %vm210_vm2, %v221_v47, 1.5  ;;  %v222_v50 = vsel %vm210_vm2, %v220_v48, %v221_v47  ;;  %v238_v51 = vsel %vm210_vm2, 1.5, %v220_v48 }
  0xaf   : > { %256 = vst.msk [vmem:[%s548_s21 + $0x58] sm:$0x7f] %vm246_vm4, %v242_v49 }
  0xb0   : > { %254 = vst.msk [vmem:[%s548_s21 + $0x48] sm:$0xff] %vm243_vm3, %v238_v51 }
  0xb1   : > { %255 = vst.msk [vmem:[%s548_s21 + $0x50] sm:$0xff] %vm243_vm3, %v222_v50 }
  0xb2 PF: > { %p11_p7 = scmp.ge.s32.totalorder %s484_s11, 4   ;;  %s614_s6 = smov %s441_s7 }
  0xb3   : > { %s615_s7 = smov %s445_s8  ;;  %s616_s8 = smov %s494_s14 }
  0xb4   : > { %s617_s9 = smov %s484_s11  ;;  %13 = sbr.rel (!%p11_p7) target bundleno = 3 (0x3), region = 64 }
  0xb9   :  { %281 = vsyncpa [#allocation3], 1 }
  0xba   :  { %283 = vsyncpa [#allocation3 + $0x1], 1 }

</bundles_post_ra>
